<compile_context>
chip_gen: v7x
topology: tpu7x:2x2x1
jax: 0.10.0
libtpu: 0.0.40
codegen_flags: <defaults>
</compile_context>

<pallas_src>
import math

import jax
import jax.numpy as jnp
from jax import lax
from jax.experimental import pallas as pl
from jax.experimental.pallas import tpu as pltpu

EPS = 1e-05

# Below this many bytes of x, the fused XLA expression beats the kernel dispatch.
_PALLAS_MIN_BYTES = 1 << 20
# Cap on the packed lane width (keeps the replicated param slab / vreg footprint small).
_MAX_PACKED_LANES = 2048


# --------------------------------------------------------------------------- kernel
def _norm1d_kernel(p_ref, x_ref, o_ref):
    # p_ref: (4, F_eff) stacked [gamma; beta; m; v]; x_ref / o_ref: (block_b, F_eff)
    p = p_ref[...].astype(jnp.float32)
    gamma = p[0:1, :]
    beta = p[1:2, :]
    m = p[2:3, :]
    v = p[3:4, :]

    # O(F) hoisted parameter math; rsqrt goes to the EUP slot (free, kernel is HBM-bound).
    scale = gamma * lax.rsqrt(v + EPS)

    x = x_ref[...].astype(jnp.float32)
    # Same association as the PyTorch forward: ((x - m) * inv) * gamma + beta.
    o_ref[...] = ((x - m) * scale + beta).astype(o_ref.dtype)


# --------------------------------------------------------------------------- helpers
def _vmem_capacity_bytes():
    try:
        return int(pltpu.get_tpu_info().vmem_capacity_bytes)
    except Exception:
        return 64 << 20  # conservative default (v7x per-TC VMEM)


def _sublane_align(itemsize):
    # f32 -> 8, bf16/f16 -> 16, int8/fp8 -> 32 (sub-32-bit dtypes pack along sublanes).
    return max(8, 32 // max(1, itemsize))


def _min_grid_steps(vmem_bytes):
    # 64 MiB per-TC VMEM => v7x (2 TensorCores): want >= 2 pipelined steps per core.
    return 4 if vmem_bytes <= (64 << 20) else 2


def _pick_block_b(b_eff, f_eff, itemsize, vmem_bytes, min_steps):
    """Sublane-aligned batch tile.

    Constraints: <= ~VMEM/6 bytes of x per block (in+out double buffering stays under
    ~2/3 of physical VMEM), >= min_steps grid steps when the batch allows, never below
    one sublane group, and prefer a tile that divides the batch (unmasked final store).
    """
    align = _sublane_align(itemsize)
    if b_eff <= align:
        return b_eff

    row_bytes = max(1, f_eff * itemsize)
    target_bytes = min(12 << 20, max(1 << 20, vmem_bytes // 6))
    rows_cap = max(align, (target_bytes // row_bytes) // align * align)

    desired = min(rows_cap, max(align, (b_eff // min_steps) // align * align))
    block = min(desired, b_eff)

    # Prefer a block that divides b_eff evenly (no ragged masked tail on the last step).
    if b_eff % block != 0:
        cand, tries = block, 0
        while cand >= align and tries < 1024:
            if b_eff % cand == 0:
                block = cand
                break
            cand -= align
            tries += 1
    return block


# --------------------------------------------------------------------------- wrapper
def norm_function_1d_reference(x, gamma, beta, m, v):
    """Plain-JAX form (XLA fuses this for free; fastest path for tiny shapes)."""
    return ((x - m) / jnp.sqrt(v + EPS)) * gamma + beta


def norm_function_1d(x, gamma, beta, m, v, *, block_b=None, force_pallas=False):
    """NormFunction1D forward.  x: (B, F); gamma/beta/m/v: (1, F)."""
    B, F = x.shape
    itemsize = jnp.dtype(x.dtype).itemsize

    # Tiny inputs (including the shipped 8x32 shape): kernel dispatch + pipeline
    # prologue dominate, so use the fused XLA expression unless explicitly forced.
    if not force_pallas and B * F * itemsize < _PALLAS_MIN_BYTES:
        return norm_function_1d_reference(x, gamma, beta, m, v)

    vmem_bytes = _vmem_capacity_bytes()
    align = _sublane_align(itemsize)

    # ---- lane-dense packing: make the last dim a multiple of 128 (unmasked vst).
    # Generalized beyond divisors of 128: repeat = lcm(F,128)//F = 128//gcd(F,128).
    repeat = 1
    if F % 128 != 0:
        r = 128 // math.gcd(F, 128)
        if r > 1 and B % r == 0 and F * r <= _MAX_PACKED_LANES:
            repeat = r
    B_eff, F_eff = B // repeat, F * repeat
    x_eff = x.reshape(B_eff, F_eff) if repeat > 1 else x

    # ---- one (4, F_eff) parameter slab: a single DMA stream instead of four.
    params = jnp.concatenate([gamma, beta, m, v], axis=0)
    if repeat > 1:
        params = jnp.tile(params, (1, repeat))

    # ---- batch tiling (generation-aware).
    min_steps = _min_grid_steps(vmem_bytes)
    if block_b is None:
        block_b = _pick_block_b(B_eff, F_eff, itemsize, vmem_bytes, min_steps)
    else:
        block_b = max(1, min(block_b, B_eff))
        if block_b < B_eff:
            block_b = max(align, (block_b // align) * align)
        # Clamp caller-supplied blocks against this chip's VMEM budget.
        rows_cap = (vmem_bytes // 6) // max(1, F_eff * itemsize)
        rows_cap = max(align, (rows_cap // align) * align)
        block_b = min(block_b, max(rows_cap, min(B_eff, align)))

    grid = (pl.cdiv(B_eff, block_b),)

    p_spec = pl.BlockSpec((4, F_eff), lambda i: (0, 0))
    x_spec = pl.BlockSpec((block_b, F_eff), lambda i: (i, 0))
    out_spec = pl.BlockSpec((block_b, F_eff), lambda i: (i, 0))

    block_bytes = block_b * F_eff * itemsize
    vmem_limit = int(min(max(4 * block_bytes + (4 << 20), 16 << 20),
                         vmem_bytes * 3 // 4))

    cost = pl.CostEstimate(
        flops=3 * B_eff * F_eff,                      # sub, mul, add per element
        transcendentals=F_eff * grid[0],              # rsqrt per grid step
        bytes_accessed=2 * B_eff * F_eff * itemsize + 4 * F_eff * params.dtype.itemsize,
    )

    out_eff = pl.pallas_call(
        _norm1d_kernel,
        out_shape=jax.ShapeDtypeStruct((B_eff, F_eff), x.dtype),
        grid_spec=pltpu.PrefetchScalarGridSpec(
            num_scalar_prefetch=0,
            grid=grid,
            in_specs=[p_spec, x_spec],
            out_specs=out_spec,
        ),
        compiler_params=pltpu.CompilerParams(
            dimension_semantics=("parallel",),
            vmem_limit_bytes=vmem_limit,
        ),
        cost_estimate=cost,
    )(params, x_eff)

    return out_eff.reshape(B, F) if repeat > 1 else out_eff


# --------------------------------------------------------------------------- demo / checks
if __name__ == "__main__":
    # 1) Shipped module shape: batch=8, features=32 (params initialized as in __init__).
    batch, features = 8, 32
    key = jax.random.PRNGKey(0)
    x = jax.random.normal(key, (batch, features), dtype=jnp.float32)
    gamma = jnp.ones((1, features), dtype=jnp.float32)
    beta = jnp.zeros((1, features), dtype=jnp.float32)
    m = jnp.ones((1, features), dtype=jnp.float32)
    v = jnp.ones((1, features), dtype=jnp.float32)

    ref = norm_function_1d_reference(x, gamma, beta, m, v)

    # Pallas path (forced — the default dispatch correctly routes this tiny shape
    # to the fused XLA expression).
    out = jax.block_until_ready(norm_function_1d(x, gamma, beta, m, v, force_pallas=True))
    assert out.shape == (batch, features)
    assert jnp.allclose(out, ref, atol=1e-5, rtol=1e-5), float(jnp.max(jnp.abs(out - ref)))

    # Default dispatch (tiny shape -> reference path).
    out_dispatch = jax.block_until_ready(norm_function_1d(x, gamma, beta, m, v))
    assert jnp.allclose(out_dispatch, ref, atol=1e-5, rtol=1e-5)

    # 2) Lane-packing path with F not a divisor of 128 (F=48 -> repeat=8) and random params.
    k1, k2, k3, k4, k5 = jax.random.split(jax.random.PRNGKey(1), 5)
    b2, f2 = 24, 48
    x2 = jax.random.normal(k1, (b2, f2), dtype=jnp.float32)
    g2 = 1.0 + 0.1 * jax.random.normal(k2, (1, f2), dtype=jnp.float32)
    be2 = 0.1 * jax.random.normal(k3, (1, f2), dtype=jnp.float32)
    m2 = jax.random.normal(k4, (1, f2), dtype=jnp.float32)
    v2 = 0.5 + jax.random.uniform(k5, (1, f2), dtype=jnp.float32)
    out2 = jax.block_until_ready(norm_function_1d(x2, g2, be2, m2, v2, force_pallas=True))
    ref2 = norm_function_1d_reference(x2, g2, be2, m2, v2)
    assert jnp.allclose(out2, ref2, atol=1e-5, rtol=1e-5), float(jnp.max(jnp.abs(out2 - ref2)))

    # 3) Ragged batch / no packing possible (B=13, F=48): exercises the masked final tile.
    b3, f3 = 13, 48
    x3 = jax.random.normal(jax.random.PRNGKey(2), (b3, f3), dtype=jnp.float32)
    g3 = jnp.ones((1, f3), jnp.float32)
    be3 = jnp.zeros((1, f3), jnp.float32)
    m3 = jnp.ones((1, f3), jnp.float32)
    v3 = jnp.ones((1, f3), jnp.float32)
    out3 = jax.block_until_ready(norm_function_1d(x3, g3, be3, m3, v3, force_pallas=True))
    ref3 = norm_function_1d_reference(x3, g3, be3, m3, v3)
    assert jnp.allclose(out3, ref3, atol=1e-5, rtol=1e-5), float(jnp.max(jnp.abs(out3 - ref3)))

    print("KERNEL_OK")
</pallas_src>

<mosaic_0001>
module attributes {stable_mosaic.version = 11 : i64} {
  func.func @_norm1d_kernel(%arg0: i32, %arg1: memref<4x128xf32, #tpu.memory_space<vmem>>, %arg2: memref<2x128xf32, #tpu.memory_space<vmem>>, %arg3: memref<2x128xf32, #tpu.memory_space<vmem>>) attributes {dimension_semantics = [#tpu.dimension_semantics<parallel>], iteration_bounds = array<i64: 1>, scalar_prefetch = 0 : i64, scratch_operands = 0 : i64, tpu.core_type = #tpu.core_type<tc>, window_params = [{pipeline_mode = #tpu.pipeline_mode<synchronous>, transform_indices = @transform_0, window_bounds = array<i64: 4, 128>}, {transform_indices = @transform_1, window_bounds = array<i64: 2, 128>}, {transform_indices = @transform_2, window_bounds = array<i64: 2, 128>}]} {
    %c0 = arith.constant 0 : index
    %c0_0 = arith.constant 0 : index
    %0 = vector.load %arg1[%c0, %c0_0] : memref<4x128xf32, #tpu.memory_space<vmem>>, vector<4x128xf32>
    %1 = vector.extract_strided_slice %0 {offsets = [0, 0], sizes = [1, 128], strides = [1, 1]} : vector<4x128xf32> to vector<1x128xf32>
    %2 = vector.extract_strided_slice %0 {offsets = [1, 0], sizes = [1, 128], strides = [1, 1]} : vector<4x128xf32> to vector<1x128xf32>
    %3 = vector.extract_strided_slice %0 {offsets = [2, 0], sizes = [1, 128], strides = [1, 1]} : vector<4x128xf32> to vector<1x128xf32>
    %4 = vector.extract_strided_slice %0 {offsets = [3, 0], sizes = [1, 128], strides = [1, 1]} : vector<4x128xf32> to vector<1x128xf32>
    %cst = arith.constant 9.99999974E-6 : f32
    %5 = vector.broadcast %cst : f32 to vector<1x128xf32>
    %6 = arith.addf %4, %5 : vector<1x128xf32>
    %7 = math.rsqrt %6 : vector<1x128xf32>
    %8 = arith.mulf %1, %7 : vector<1x128xf32>
    %c0_1 = arith.constant 0 : index
    %c0_2 = arith.constant 0 : index
    %9 = vector.load %arg2[%c0_1, %c0_2] : memref<2x128xf32, #tpu.memory_space<vmem>>, vector<2x128xf32>
    %10 = vector.broadcast %3 : vector<1x128xf32> to vector<2x128xf32>
    %11 = arith.subf %9, %10 : vector<2x128xf32>
    %12 = vector.broadcast %8 : vector<1x128xf32> to vector<2x128xf32>
    %13 = arith.mulf %11, %12 : vector<2x128xf32>
    %14 = vector.broadcast %2 : vector<1x128xf32> to vector<2x128xf32>
    %15 = arith.addf %13, %14 : vector<2x128xf32>
    %c0_3 = arith.constant 0 : index
    %c0_4 = arith.constant 0 : index
    %16 = vector.load %arg3[%c0_3, %c0_4] : memref<2x128xf32, #tpu.memory_space<vmem>>, vector<2x128xf32>
    tpu.vector_store %arg3[%c0_3, %c0_4], %15 {strides = array<i32>} : memref<2x128xf32, #tpu.memory_space<vmem>>, vector<2x128xf32>,
    return
  }
  func.func @transform_0(%arg0: i32) -> (i32, i32) {
    %c0_i32 = arith.constant 0 : i32
    %c0_i32_0 = arith.constant 0 : i32
    %c0_i32_1 = arith.constant 0 : i32
    return %c0_i32, %c0_i32_0 : i32, i32
  }
  func.func @transform_1(%arg0: i32) -> (i32, i32) {
    %c0_i32 = arith.constant 0 : i32
    %c0_i32_0 = arith.constant 0 : i32
    return %arg0, %c0_i32 : i32, i32
  }
  func.func @transform_2(%arg0: i32) -> (i32, i32) {
    %c0_i32 = arith.constant 0 : i32
    %c0_i32_0 = arith.constant 0 : i32
    return %arg0, %c0_i32 : i32, i32
  }
}

</mosaic_0001>

<bundles_post_ra>
// kernel: tpu_custom_call.1
= control target key start
LH: loop header
LB: loop body
LE: loop exit
PB: predicated region body
PF: predicated region fallthrough
CT: control target
= control target key end

     0   :  { %7 = vsyncpa [#allocation3], 0  ;;  %s159_s0 = inlined_call_operand.hbm [shape: f32[4,128], index: 0, kind: input, shape index: {}]   ;;  %s160_s1 = inlined_call_operand.vmem [shape: f32[2,128], index: 1, kind: input, shape index: {}]   ;;  %s161_s2 = inlined_call_operand.hbm [shape: f32[2,128], index: 2, kind: output, shape index: {}]  }
   0x1   :  { %8 = vsyncpa [#allocation4], 0  ;;  %s115_s9 = smov [#allocation2]   ;;  %s67_s13 = scalar_lea.hbm %s159_s0, 64 }
   0x2   :  { %s15_s10 = sshll.u32 %s115_s9, 4  ;;  %p68_p0 = scmp.ne.s32.totalorder %s159_s0, %s67_s13  ;;  %s16_s10 = int_to_ptr.vmem [resolvable:$true] %s15_s10 }
   0x3   :  { %p71_p1 = scmp.lt.u32.totalorder %s67_s13, %s159_s0 }
   0x5   :  { %p73_p2 = pnand %p71_p1, %p68_p0 }
   0x7   :  { %76 = shalt.err (!%p73_p2)
}
   0x8   :  { %s77_s18 = scalar_lea.vmem %s16_s10, 64  ;;  %p82_p4 = scmp.lt.s32.totalorder %s16_s10, %s16_s10 }
   0x9   :  { %p78_p3 = scmp.ne.s32.totalorder %s16_s10, %s77_s18  ;;  %p83_p5 = scmp.lt.s32.totalorder %s77_s18, %s77_s18 }
   0xb   :  { %p84_p6 = por %p83_p5, %p82_p4 }
   0xd   :  { %p85_p7 = pnand %p84_p6, %p78_p3 }
   0xf   :  { %88 = shalt.err (!%p85_p7)
}
  0x10   :  { %18 = dma.hbm_to_vmem [thread:$0]  %s159_s0, 64, %s16_s10, [#allocation3]  }
  0x11   :  { %111 = dma.done.wait [#allocation3], 64  }
  0x12   :  { %112 = vsyncadd [#allocation3], 4294967232  ;;  %v24_v0 = vld [vmem:[#allocation2] sm:$0xf]  ;;  %v32_v1 = vlaneseq  ;;  %s116_s0 = smov [#allocation5]  }
  0x13   :  { %v25_v2 = vadd.f32 1e-05, %v24_v0  ;;  %v31_v7 = vld [vmem:[%s160_s1] sm:$0x3]  ;;  %s54_s23 = sshll.u32 %s116_s0, 4  ;;  %s55_s23 = int_to_ptr.vmem [resolvable:$true] %s54_s23 }
  0x14   :  { %v33_v3 = vshrl.u32 %v32_v1, 7  ;;  %s89_s24 = scalar_lea.vmem %s55_s23, 32  ;;  %p94_p9 = scmp.lt.s32.totalorder %s55_s23, %s55_s23 }
  0x15   :  { %65 = vrsqrt.f32 %v25_v2  ;;  %p90_p8 = scmp.ne.s32.totalorder %s55_s23, %s89_s24  ;;  %p95_p10 = scmp.lt.s32.totalorder %s89_s24, %s89_s24 }
  0x16   :  { %v34_v4 = vsub.s32 2, %v33_v3  ;;  %v39_v9 = vsub.s32 0, %v33_v3  ;;  %v44_v10 = vsub.s32 1, %v33_v3 }
  0x17   :  { %p96_p11 = por %p95_p10, %p94_p9 }
  0x18   :  { %v35_v5 = vrot.slane %v24_v0, %v34_v4  ;;  %v45_v14 = vrot.slane %v24_v0, %v44_v10 }
  0x19   :  { %p97_p12 = pnand %p96_p11, %p90_p8 }
  0x1a   :  { %v36_v12 = vsub.f32 %v31_v7, %v35_v5 }
  0x1f   :  { %v66_v6 = vpop.eup %65 }
  0x20   :  { %v28_v8 = vrot.slane %v66_v6, 3 }
  0x22   :  { %v30_v11 = vmul.f32 %v28_v8, %v24_v0 }
  0x24   :  { %v40_v13 = vrot.slane %v30_v11, %v39_v9 }
  0x26   :  { %v41_v15 = vmul.f32 %v40_v13, %v36_v12 }
  0x28   :  { %v46_v16 = vadd.f32 %v45_v14, %v41_v15 }
  0x2a   :  { %47 = vst [vmem:[#allocation5] sm:$0x3] %v46_v16 }
  0x2b   :  { %100 = shalt.err (!%p97_p12)
}
  0x2c   :  { %s101_s26 = scalar_lea.hbm %s161_s2, 32 }
  0x2d   :  { %p102_p13 = scmp.ne.s32.totalorder %s161_s2, %s101_s26  ;;  %p105_p0 = scmp.lt.u32.totalorder %s101_s26, %s161_s2 }
  0x2f   :  { %p107_p1 = pnand %p105_p0, %p102_p13 }
  0x31   :  { %110 = shalt.err (!%p107_p1)
}
  0x32   :  { %57 = dma.vmem_to_hbm [thread:$0]  %s55_s23, 32, %s161_s2, [#allocation4]  }
  0x33   :  { %113 = dma.done.wait [#allocation4], 32  }
  0x34   :  { %114 = vsyncadd [#allocation4], 4294967264 }
  0x35   :  { %61 = vsyncpa [#allocation3], 1 }
  0x36   :  { %62 = vsyncpa [#allocation4], 1 }

</bundles_post_ra>
